<compile_context>
chip_gen: v7x
topology: tpu7x:2x2x1
jax: 0.10.0
libtpu: 0.0.40
codegen_flags: <defaults>
</compile_context>

<pallas_src>
import functools

import jax
import jax.numpy as jnp
from jax.experimental import pallas as pl
from jax.experimental.pallas import tpu as pltpu


def _mlp_sigmoid_kernel(n_layers, alpha, vpu_head, compute_dtype, *refs):
    # refs = (x_ref, w0_ref, b0_ref, w1_ref, b1_ref, ..., o_ref)
    x_ref, *wb, o_ref = refs

    h = x_ref[...]                      # (in_feat, TILE_B): batch on lanes
    if h.dtype != jnp.float32:
        h = h.astype(jnp.float32)

    # Hidden layers: MXU matmul (bf16 in / f32 acc) + bias + ELU(alpha) in f32.
    for li in range(n_layers - 1):
        w = wb[2 * li][...]             # (out_i, in_i)  torch layout
        b = wb[2 * li + 1][...]         # (out_i, 1)
        h = jnp.dot(w.astype(compute_dtype), h.astype(compute_dtype),
                    preferred_element_type=jnp.float32) + b
        # nn.ELU(alpha): clamp the exp argument so the dead branch never
        # overflows (keeps the select branch-free and NaN-free).
        neg = alpha * (jnp.exp(jnp.minimum(h, 0.0)) - 1.0)
        h = jnp.where(h > 0, h, neg)

    w_last = wb[-2][...]
    b_last = wb[-1][...]
    if vpu_head:
        # out_dim == 1: VPU broadcast-multiply + sublane reduce instead of a
        # 1-column MXU matmul (no MXU round trip, result already lane-dense).
        # w_last: (hidden, 1); b_last: (1, 1); logits: (1, TILE_B).
        logits = jnp.sum(h * w_last, axis=0, keepdims=True) + b_last
    else:
        logits = jnp.dot(w_last.astype(compute_dtype), h.astype(compute_dtype),
                         preferred_element_type=jnp.float32) + b_last

    # Exact sigmoid: exp on the EUP, exact reciprocal (full Newton refinement).
    y = 1.0 / (1.0 + jnp.exp(-logits))
    o_ref[...] = y.astype(o_ref.dtype)  # (out_dim, TILE_B): full-lane stores


def sn_discriminator_forward(z, params, *, alpha=0.2, tile_b=None,
                             compute_dtype=jnp.bfloat16):
    """z: [batch, input_size]; params: list of (W [out,in], b [out]) already W/sigma."""
    B, in_feat = z.shape
    n_layers = len(params)
    out_dim = params[-1][0].shape[0]
    vpu_head = (out_dim == 1)

    # Batch tile: large (>= ~1 MiB per activation tile) to amortize per-step
    # overhead and keep the HBM<->VMEM pipeline busy. Budget is tiny here
    # (32 f32 features -> 128 B/row), so 8192 rows = 1 MiB, far under the
    # 32 MiB scoped VMEM default even on v7x (64 MiB physical).
    if tile_b is None:
        tile_b = 8192
    if B <= tile_b or B < 128:
        tile_b = B                              # single tile: full-extent block is always legal
    else:
        tile_b = max(128, (tile_b // 128) * 128)  # lane-axis blocks must be 128-aligned

    # Kernel-layout parameters: weights in torch [out, in] layout, biases as
    # [out, 1] columns; the out_dim==1 head gets its weight as a [hidden, 1] column.
    kparams = []
    for li, (w, b) in enumerate(params):
        if li == n_layers - 1 and vpu_head:
            kparams.append((w.T, b.reshape(1, 1)))
        else:
            kparams.append((w, b.reshape(-1, 1)))

    flat = []
    in_specs = [pl.BlockSpec((in_feat, tile_b), lambda i: (0, i))]   # streamed per tile
    for w, b in kparams:
        flat += [w, b]
        in_specs += [pl.BlockSpec(w.shape, lambda i: (0, 0)),        # VMEM-resident
                     pl.BlockSpec(b.shape, lambda i: (0, 0))]

    kernel = functools.partial(_mlp_sigmoid_kernel, n_layers, alpha,
                               vpu_head, compute_dtype)
    out_t = pl.pallas_call(
        kernel,
        grid=(pl.cdiv(B, tile_b),),
        in_specs=in_specs,
        out_specs=pl.BlockSpec((out_dim, tile_b), lambda i: (0, i)),
        out_shape=jax.ShapeDtypeStruct((out_dim, B), z.dtype),
        compiler_params=pltpu.CompilerParams(
            dimension_semantics=("parallel",)),   # v7x: shard batch tiles over 2 TCs
    )(z.T, *flat)                                  # feature-major activations into the kernel
    return out_t.T                                 # back to [batch, out_dim]


# ---------------- parameter setup (plain JAX glue, not the hot path) ----------------

def _spectral_normalize(w, key, power_iterations=1, eps=1e-12):
    """w: [out, in] (torch Linear layout). One power iteration, W / sigma."""
    u = jax.random.normal(key, (w.shape[0],), dtype=w.dtype)
    u = u / (jnp.linalg.norm(u) + eps)
    v = None
    for _ in range(power_iterations):
        v = w.T @ u
        v = v / (jnp.linalg.norm(v) + eps)
        u = w @ v
        u = u / (jnp.linalg.norm(u) + eps)
    sigma = u @ (w @ v)
    return w / sigma


def make_sn_discriminator_params(key, input_size, n_hidden, hidden_size, output_size):
    """Deterministic init mimicking nn.Linear default, then spectral-normalize.

    Returns a list of (W [out, in], b [out]) in torch layout."""
    dims = [input_size] + [hidden_size] * n_hidden + [output_size]
    params = []
    for li in range(len(dims) - 1):
        fan_in, fan_out = dims[li], dims[li + 1]
        key, kw, kb, ku = jax.random.split(key, 4)
        bound = 1.0 / jnp.sqrt(fan_in)
        w = jax.random.uniform(kw, (fan_out, fan_in), jnp.float32, -bound, bound)
        b = jax.random.uniform(kb, (fan_out,), jnp.float32, -bound, bound)
        params.append((_spectral_normalize(w, ku), b))
    return params


if __name__ == "__main__":
    key = jax.random.PRNGKey(0)
    # SN_Discriminator(input_size=32, n_hidden=2, hidden_size=32, output_size=1)
    input_size, n_hidden, hidden_size, output_size = 32, 2, 32, 1

    def reference(z, params, alpha=0.2):
        h = z
        for li, (w, b) in enumerate(params):
            h = h @ w.T + b
            if li < len(params) - 1:
                h = jnp.where(h > 0, h, alpha * (jnp.exp(jnp.minimum(h, 0.0)) - 1.0))
        return jax.nn.sigmoid(h)

    kz, kp = jax.random.split(key)
    params = make_sn_discriminator_params(kp, input_size, n_hidden,
                                          hidden_size, output_size)

    # (1) Multi-tile pipelined path: 2 batch tiles of 128 lanes, bf16 MXU matmuls.
    z = jax.random.normal(kz, (256, input_size), dtype=jnp.float32)
    out = sn_discriminator_forward(z, params, alpha=0.2, tile_b=128)
    jax.block_until_ready(out)
    assert out.shape == (256, output_size)
    assert jnp.max(jnp.abs(out - reference(z, params))) < 2e-2   # bf16 matmul tolerance

    # (2) Tiny-batch single-tile path, full f32 compute (tight tolerance).
    z2 = z[:8]
    out2 = sn_discriminator_forward(z2, params, alpha=0.2, compute_dtype=jnp.float32)
    jax.block_until_ready(out2)
    assert out2.shape == (8, output_size)
    assert jnp.max(jnp.abs(out2 - reference(z2, params))) < 1e-3

    print("KERNEL_OK")
</pallas_src>

<mosaic_0001>
module attributes {stable_mosaic.version = 11 : i64} {
  func.func @_mlp_sigmoid_kernel(%arg0: i32, %arg1: memref<32x128xf32, #tpu.memory_space<vmem>>, %arg2: memref<32x32xf32, #tpu.memory_space<vmem>>, %arg3: memref<32x1xf32, #tpu.memory_space<vmem>>, %arg4: memref<32x32xf32, #tpu.memory_space<vmem>>, %arg5: memref<32x1xf32, #tpu.memory_space<vmem>>, %arg6: memref<32x1xf32, #tpu.memory_space<vmem>>, %arg7: memref<1x1xf32, #tpu.memory_space<vmem>>, %arg8: memref<1x128xf32, #tpu.memory_space<vmem>>) attributes {dimension_semantics = [#tpu.dimension_semantics<parallel>], iteration_bounds = array<i64: 2>, scalar_prefetch = 0 : i64, scratch_operands = 0 : i64, tpu.core_type = #tpu.core_type<tc>, window_params = [{transform_indices = @transform_0, window_bounds = array<i64: 32, 128>}, {pipeline_mode = #tpu.pipeline_mode<synchronous>, transform_indices = @transform_1, window_bounds = array<i64: 32, 32>}, {pipeline_mode = #tpu.pipeline_mode<synchronous>, transform_indices = @transform_2, window_bounds = array<i64: 32, 1>}, {pipeline_mode = #tpu.pipeline_mode<synchronous>, transform_indices = @transform_3, window_bounds = array<i64: 32, 32>}, {pipeline_mode = #tpu.pipeline_mode<synchronous>, transform_indices = @transform_4, window_bounds = array<i64: 32, 1>}, {pipeline_mode = #tpu.pipeline_mode<synchronous>, transform_indices = @transform_5, window_bounds = array<i64: 32, 1>}, {pipeline_mode = #tpu.pipeline_mode<synchronous>, transform_indices = @transform_6, window_bounds = array<i64: 1, 1>}, {transform_indices = @transform_7, window_bounds = array<i64: 1, 128>}]} {
    %c0 = arith.constant 0 : index
    %c0_0 = arith.constant 0 : index
    %0 = vector.load %arg1[%c0, %c0_0] : memref<32x128xf32, #tpu.memory_space<vmem>>, vector<32x128xf32>
    %c0_1 = arith.constant 0 : index
    %c0_2 = arith.constant 0 : index
    %1 = vector.load %arg2[%c0_1, %c0_2] : memref<32x32xf32, #tpu.memory_space<vmem>>, vector<32x32xf32>
    %c0_3 = arith.constant 0 : index
    %c0_4 = arith.constant 0 : index
    %2 = vector.load %arg3[%c0_3, %c0_4] : memref<32x1xf32, #tpu.memory_space<vmem>>, vector<32x1xf32>
    %3 = arith.truncf %1 : vector<32x32xf32> to vector<32x32xbf16>
    %4 = arith.truncf %0 : vector<32x128xf32> to vector<32x128xbf16>
    %cst = arith.constant dense<0.000000e+00> : vector<32x128xf32>
    %5 = tpu.matmul %3, %4, %cst {dimension_numbers = #tpu.dot_dimension_numbers<[1], [0], [0], [1], [0, 0, 1, 1], [], []>} : vector<32x32xbf16>, vector<32x128xbf16>, vector<32x128xf32> -> vector<32x128xf32>
    %6 = vector.broadcast %2 : vector<32x1xf32> to vector<32x128xf32>
    %7 = arith.addf %5, %6 : vector<32x128xf32>
    %cst_5 = arith.constant 0.000000e+00 : f32
    %8 = vector.broadcast %cst_5 : f32 to vector<32x128xf32>
    %9 = arith.minimumf %7, %8 : vector<32x128xf32>
    %10 = math.exp %9 : vector<32x128xf32>
    %cst_6 = arith.constant 1.000000e+00 : f32
    %11 = vector.broadcast %cst_6 : f32 to vector<32x128xf32>
    %12 = arith.subf %10, %11 : vector<32x128xf32>
    %cst_7 = arith.constant 2.000000e-01 : f32
    %13 = vector.broadcast %cst_7 : f32 to vector<32x128xf32>
    %14 = arith.mulf %13, %12 : vector<32x128xf32>
    %cst_8 = arith.constant 0.000000e+00 : f32
    %15 = vector.broadcast %cst_8 : f32 to vector<32x128xf32>
    %16 = arith.cmpf ogt, %7, %15 : vector<32x128xf32>
    %17 = arith.select %16, %7, %14 : vector<32x128xi1>, vector<32x128xf32>
    %c0_9 = arith.constant 0 : index
    %c0_10 = arith.constant 0 : index
    %18 = vector.load %arg4[%c0_9, %c0_10] : memref<32x32xf32, #tpu.memory_space<vmem>>, vector<32x32xf32>
    %c0_11 = arith.constant 0 : index
    %c0_12 = arith.constant 0 : index
    %19 = vector.load %arg5[%c0_11, %c0_12] : memref<32x1xf32, #tpu.memory_space<vmem>>, vector<32x1xf32>
    %20 = arith.truncf %18 : vector<32x32xf32> to vector<32x32xbf16>
    %21 = arith.truncf %17 : vector<32x128xf32> to vector<32x128xbf16>
    %cst_13 = arith.constant dense<0.000000e+00> : vector<32x128xf32>
    %22 = tpu.matmul %20, %21, %cst_13 {dimension_numbers = #tpu.dot_dimension_numbers<[1], [0], [0], [1], [0, 0, 1, 1], [], []>} : vector<32x32xbf16>, vector<32x128xbf16>, vector<32x128xf32> -> vector<32x128xf32>
    %23 = vector.broadcast %19 : vector<32x1xf32> to vector<32x128xf32>
    %24 = arith.addf %22, %23 : vector<32x128xf32>
    %cst_14 = arith.constant 0.000000e+00 : f32
    %25 = vector.broadcast %cst_14 : f32 to vector<32x128xf32>
    %26 = arith.minimumf %24, %25 : vector<32x128xf32>
    %27 = math.exp %26 : vector<32x128xf32>
    %cst_15 = arith.constant 1.000000e+00 : f32
    %28 = vector.broadcast %cst_15 : f32 to vector<32x128xf32>
    %29 = arith.subf %27, %28 : vector<32x128xf32>
    %cst_16 = arith.constant 2.000000e-01 : f32
    %30 = vector.broadcast %cst_16 : f32 to vector<32x128xf32>
    %31 = arith.mulf %30, %29 : vector<32x128xf32>
    %cst_17 = arith.constant 0.000000e+00 : f32
    %32 = vector.broadcast %cst_17 : f32 to vector<32x128xf32>
    %33 = arith.cmpf ogt, %24, %32 : vector<32x128xf32>
    %34 = arith.select %33, %24, %31 : vector<32x128xi1>, vector<32x128xf32>
    %c0_18 = arith.constant 0 : index
    %c0_19 = arith.constant 0 : index
    %35 = vector.load %arg6[%c0_18, %c0_19] : memref<32x1xf32, #tpu.memory_space<vmem>>, vector<32x1xf32>
    %c0_20 = arith.constant 0 : index
    %c0_21 = arith.constant 0 : index
    %36 = vector.load %arg7[%c0_20, %c0_21] : memref<1x1xf32, #tpu.memory_space<vmem>>, vector<1x1xf32>
    %37 = vector.broadcast %35 : vector<32x1xf32> to vector<32x128xf32>
    %38 = arith.mulf %34, %37 : vector<32x128xf32>
    %cst_22 = arith.constant dense<0.000000e+00> : vector<128xf32>
    %39 = vector.multi_reduction <add>, %38, %cst_22 [0] : vector<32x128xf32> to vector<128xf32>
    %40 = vector.shape_cast %39 : vector<128xf32> to vector<1x128xf32>
    %41 = vector.broadcast %36 : vector<1x1xf32> to vector<1x128xf32>
    %42 = arith.addf %40, %41 : vector<1x128xf32>
    %cst_23 = arith.constant 0.000000e+00 : f32
    %43 = vector.broadcast %cst_23 : f32 to vector<1x128xf32>
    %44 = arith.subf %43, %42 : vector<1x128xf32>
    %45 = math.exp %44 : vector<1x128xf32>
    %cst_24 = arith.constant 1.000000e+00 : f32
    %46 = vector.broadcast %cst_24 : f32 to vector<1x128xf32>
    %47 = arith.addf %46, %45 : vector<1x128xf32>
    %cst_25 = arith.constant 1.000000e+00 : f32
    %48 = vector.broadcast %cst_25 : f32 to vector<1x128xf32>
    %49 = arith.divf %48, %47 : vector<1x128xf32>
    %c0_26 = arith.constant 0 : index
    %c0_27 = arith.constant 0 : index
    %50 = vector.load %arg8[%c0_26, %c0_27] : memref<1x128xf32, #tpu.memory_space<vmem>>, vector<1x128xf32>
    tpu.vector_store %arg8[%c0_26, %c0_27], %49 {strides = array<i32>} : memref<1x128xf32, #tpu.memory_space<vmem>>, vector<1x128xf32>,
    return
  }
  func.func @transform_0(%arg0: i32) -> (i32, i32) {
    %c0_i32 = arith.constant 0 : i32
    %c0_i32_0 = arith.constant 0 : i32
    return %c0_i32, %arg0 : i32, i32
  }
  func.func @transform_1(%arg0: i32) -> (i32, i32) {
    %c0_i32 = arith.constant 0 : i32
    %c0_i32_0 = arith.constant 0 : i32
    %c0_i32_1 = arith.constant 0 : i32
    return %c0_i32, %c0_i32_0 : i32, i32
  }
  func.func @transform_2(%arg0: i32) -> (i32, i32) {
    %c0_i32 = arith.constant 0 : i32
    %c0_i32_0 = arith.constant 0 : i32
    %c0_i32_1 = arith.constant 0 : i32
    return %c0_i32, %c0_i32_0 : i32, i32
  }
  func.func @transform_3(%arg0: i32) -> (i32, i32) {
    %c0_i32 = arith.constant 0 : i32
    %c0_i32_0 = arith.constant 0 : i32
    %c0_i32_1 = arith.constant 0 : i32
    return %c0_i32, %c0_i32_0 : i32, i32
  }
  func.func @transform_4(%arg0: i32) -> (i32, i32) {
    %c0_i32 = arith.constant 0 : i32
    %c0_i32_0 = arith.constant 0 : i32
    %c0_i32_1 = arith.constant 0 : i32
    return %c0_i32, %c0_i32_0 : i32, i32
  }
  func.func @transform_5(%arg0: i32) -> (i32, i32) {
    %c0_i32 = arith.constant 0 : i32
    %c0_i32_0 = arith.constant 0 : i32
    %c0_i32_1 = arith.constant 0 : i32
    return %c0_i32, %c0_i32_0 : i32, i32
  }
  func.func @transform_6(%arg0: i32) -> (i32, i32) {
    %c0_i32 = arith.constant 0 : i32
    %c0_i32_0 = arith.constant 0 : i32
    %c0_i32_1 = arith.constant 0 : i32
    return %c0_i32, %c0_i32_0 : i32, i32
  }
  func.func @transform_7(%arg0: i32) -> (i32, i32) {
    %c0_i32 = arith.constant 0 : i32
    %c0_i32_0 = arith.constant 0 : i32
    return %c0_i32, %arg0 : i32, i32
  }
}

</mosaic_0001>

<bundles_post_ra>
// kernel: tpu_custom_call.1
= control target key start
LH: loop header
LB: loop body
LE: loop exit
PB: predicated region body
PF: predicated region fallthrough
CT: control target
= control target key end

     0   :  { %s1186_s0 = inlined_call_operand.vmem [shape: f32[32,256], index: 0, kind: input, shape index: {}]   ;;  %s1187_s1 = inlined_call_operand.vmem [shape: f32[32,32], index: 1, kind: input, shape index: {}]   ;;  %s1188_s2 = inlined_call_operand.vmem [shape: f32[32,1], index: 2, kind: input, shape index: {}]   ;;  %s1189_s3 = inlined_call_operand.hbm [shape: f32[32,32], index: 3, kind: input, shape index: {}]   ;;  %s1190_s4 = inlined_call_operand.vmem [shape: f32[32,1], index: 4, kind: input, shape index: {}]   ;;  %s1191_s5 = inlined_call_operand.vmem [shape: f32[32,1], index: 5, kind: input, shape index: {}]   ;;  %s1192_s6 = inlined_call_operand.<no memory space> [shape: f32[1,1], index: 6, kind: input, shape index: {}]   ;;  %s1193_s7 = inlined_call_operand.hbm [shape: f32[1,256], index: 7, kind: output, shape index: {}]  }
   0x1   :  { %v12_v0 = vstv %s1192_s6 }
   0x2   :  { %13 = vst [vmem:[#allocation2] sm:$0x1] %v12_v0 }
   0x3   :  { %14 = vsyncpa [#allocation5], 0 }
   0x4   :  { %15 = vsyncpa [#allocation6], 0 }
   0x5   :  { %17 = vsyncpa [#allocation6 + $0x1], 0  ;;  %s983_s26 = smov 0   ;;  %s985_s27 = smov 0  }
   0x6   :  { %s987_s28 = smov 0   ;;  %s989_s29 = smov 0  }
   0x7 LB: > { %s1004_s6 = sadd.s32 4294967295, %s933_s29   ;;  %s716_s30 = sadd.s32 4294967294, %s933_s29   ;;  %s933_s29 = sphi %s989_s29, %s1211_s29   ;;  %s929_s28 = sphi %s987_s28, %s1210_s28   ;;  %s925_s27 = sphi %s985_s27, %s1209_s27   ;;  %s921_s26 = sphi %s983_s26, %s1208_s26  }
   0x8   : > { %s1008_s8 = sadd.s32 1, %s933_s29   ;;  %s30_s9 = sadd.s32 1, %s929_s28 }
   0x9   : > { %s27_s10 = ssub.s32 %s933_s29, %s1008_s8  ;;  %p37_p0 = scmp.ne.s32.totalorder %s929_s28, %s925_s27 }
   0xa   : > { %p28_p1 = scmp.eq.s32.totalorder %s27_s10, 0  ;;  %p38_p2 = scmp.eq.s32.totalorder %s933_s29, 0 }
   0xb   : > { %p193_p3 = scmp.eq.s32.totalorder %s1004_s6, 1  ;;  %p198_p4 = scmp.ne.s32.totalorder %s925_s27, %s921_s26 }
   0xc   : > { %s1020_s11 = scalar_select %p28_p1, %s929_s28, %s30_s9  }
   0xd   : > { %p1022_p5 = por %p38_p2, %p37_p0  ;;  %p1026_p6 = por %p193_p3, %p37_p0 }
   0xe   : > { %p199_p7 = scmp.eq.s32.totalorder %s716_s30, 1  ;;  %p717_p8 = scmp.ge.s32.totalorder %s933_s29, 1 }
   0xf   : > { %s1197_s12 = scalar_select %p1022_p5, 1, 0 }
  0x10   : > { %s1198_s13 = scalar_select %p1026_p6, 1, 0 }
  0x11   : > { %p206_p9 = scmp.lt.s32.totalorder %s933_s29, 3  ;;  %p1032_p10 = por %p199_p7, %p198_p4 }
  0x12   : > { %p1194_p11 = scmp.eq.s32.totalorder %s1004_s6, 0  ;;  %s935_s16 = smov [#allocation4]  }
  0x13   : > { %s1199_s14 = scalar_select %p1032_p10, 1, 0 }
  0x14   : > { %p1037_p12 = pnand %p717_p8, %p206_p9  ;;  %s224_s17 = sshll.u32 %s935_s16, 4  ;;  %s225_s17 = int_to_ptr.vmem [resolvable:$true] %s224_s17 }
  0x15   : > { %s839_s21 = scalar_lea.hbm %s1189_s3, 512 }
  0x16   : > { %s1200_s15 = scalar_select %p1037_p12, 1, 0 }
  0x17   : > { %p770_p13 = pneg %p1037_p12  ;;  %p840_p1 = scmp.ne.s32.totalorder %s1189_s3, %s839_s21 }
  0x18   : > { %p846_p7 = scmp.lt.u32.totalorder %s839_s21, %s1189_s3 }
  0x19   : > { %p1045_p0 = pnand %p1194_p11, %p770_p13 }
  0x1b   : > { %p841_p2 = pneg %p1045_p0 }
  0x1d   : > { %p842_p3 = pnand %p841_p2, %p840_p1 }
  0x1f   : > { %p843_p4 = pneg %p842_p3 }
  0x21   : > { %p848_p8 = pnand %p846_p7, %p843_p4 }
  0x23   : > { %851 = shalt.err (!%p848_p8)
}
  0x24   : > { %s852_s30 = scalar_lea.vmem %s225_s17, 512  ;;  %p860_p10 = scmp.lt.s32.totalorder %s225_s17, %s225_s17 }
  0x25   : > { %p853_p9 = scmp.ne.s32.totalorder %s225_s17, %s852_s30  ;;  %p861_p6 = scmp.lt.s32.totalorder %s852_s30, %s852_s30 }
  0x27   : > { %p855_p13 = pnand %p853_p9, %p841_p2  ;;  %p862_p12 = por %p861_p6, %p860_p10 }
  0x29   : > { %p856_p11 = pneg %p855_p13 }
  0x2b   : > { %p863_p5 = pnand %p862_p12, %p856_p11 }
  0x2d   : > { %866 = shalt.err (!%p863_p5)
}
  0x2e   : > { %s936_s9 = smov 128   ;;  %s937_s10 = smov 8  }
  0x2f   : > { %773 = dma.hbm_to_vmem [thread:$0]  (!%p1045_p0), %s1189_s3, 512, %s225_s17, [#allocation5], %s936_s9, %s936_s9, %s937_s10  }
  0x30   : > { %p719_p1 = scmp.ge.s32.totalorder %s933_s29, 2 }
  0x31   : > { %p1202_p2 = scmp.ne.s32.totalorder (!%p719_p1), %s1197_s12, 0 }
  0x32   : > { %243 = sbr.rel (%p719_p1) target bundleno = 64 (0x40), region = 40 }
  0x39   : > { %246 = sbr.rel (!%p1202_p2) target bundleno = 64 (0x40), region = 44  ;;  %s248_s20 = sand.u32 (%p1202_p2), 1, %s929_s28  }
  0x3a   : > { %s721_s21 = sshll.u32 (%p1202_p2), %s933_s29, 3  ;;  %s720_s22 = sshll.u32 (%p1202_p2), %s248_s20, 5 }
  0x3b   : > { %s252_s18 = scalar_lea.vmem (%p1202_p2), %s1186_s0, %s721_s21  ;;  %s250_s17 = scalar_lea.vmem (%p1202_p2), [#allocation3], %s720_s22 }
  0x3c   : > { %v286_v1 = vld [vmem:[%s252_s18] sm:$0xff] (%p1202_p2)  ;;  %v288_v2 = vld [vmem:[%s252_s18 + $0x10] sm:$0xff] (%p1202_p2) }
  0x3d   : > { %v290_v3 = vld [vmem:[%s252_s18 + $0x20] sm:$0xff] (%p1202_p2)  ;;  %287 = vst [vmem:[%s250_s17] sm:$0xff] (%p1202_p2), %v286_v1  ;;  %289 = vst [vmem:[%s250_s17 + $0x8] sm:$0xff] (%p1202_p2), %v288_v2  ;;  %v292_v4 = vld [vmem:[%s252_s18 + $0x30] sm:$0xff] (%p1202_p2) }
  0x3e   : > { %291 = vst [vmem:[%s250_s17 + $0x10] sm:$0xff] (%p1202_p2), %v290_v3  ;;  %293 = vst [vmem:[%s250_s17 + $0x18] sm:$0xff] (%p1202_p2), %v292_v4 }
  0x40 PF: > { %p1203_p5 = scmp.ne.s32.totalorder %s1200_s15, 0 }
  0x41   : > { %s1078_s12 = sand.u32 (!%p1203_p5), 1, %s925_s27   ;;  %p1204_p6 = scmp.eq.s32.totalorder (!%p1203_p5), %s1004_s6, 0 }
  0x42   : > { %302 = sbr.rel (%p1203_p5) target bundleno = 633 (0x279), region = 82  ;;  %s723_s25 = sshll.u32 (!%p1203_p5), %s1078_s12, 5 }
  0x43   : > { %s307_s30 = scalar_lea.vmem (!%p1203_p5), [#allocation3], %s723_s25 }
  0x49   : > { %912 = dma.done.wait (%p1204_p6), [#allocation5], 512   ;;  %p1205_p10 = pmov %p1204_p6 }
  0x4a   : > { %v938_v5 = vmov 0   ;;  %v340_v6 = vld [vmem:[%s307_s30] sm:$0xff]  ;;  %v341_v7 = vld [vmem:[%s307_s30 + $0x8] sm:$0xff]  ;;  %v342_v8 = vld [vmem:[%s307_s30 + $0x10] sm:$0xff]  ;;  %vm376_vm0 = vcmask 261120   ;;  %s737_s19 = sshll.u32 %s1004_s6, 4 }
  0x4b   : > { %914 = vsyncadd (%p1205_p10), [#allocation5], 4294966784  ;;  %817 = vset.pattern.permute.xlu0 %v938_v5  ;;  %818 = vset.pattern.permute.xlu1 %v938_v5  ;;  %v354_v9 = vpack.c.bf16 %v341_v7, %v340_v6  ;;  %v343_v10 = vld [vmem:[%s307_s30 + $0x18] sm:$0xff]  ;;  %v345_v12 = vld [vmem:[%s1187_s1 + $0x8] sm:$0xff]  ;;  %s338_s20 = scalar_lea.vmem [#allocation7], %s1078_s12  ;;  %s1142_s24 = scalar_lea.hbm %s1193_s7, %s737_s19 }
  0x4c   : > { %v344_v11 = vld [vmem:[%s1187_s1] sm:$0xff]  ;;  %v355_v13 = vpack.c.bf16 %v343_v10, %v342_v8  ;;  %v350_v16 = vld [vmem:[%s1188_s2 + $0x10] sm:$0xff]  ;;  %v347_v18 = vld [vmem:[%s1187_s1 + $0x18] sm:$0xff]  ;;  %s643_s21 = sshll.u32 %s338_s20, 4  ;;  %s631_s18 = scalar_lea.sflag [#allocation6], %s1078_s12  ;;  %s1144_s21 = int_to_ptr.vmem [resolvable:$true] %s643_s21 }
  0x4d   : > { %v352_v14 = vpack.c.bf16 %v345_v12, %v344_v11  ;;  %v348_v15 = vld [vmem:[%s1188_s2] sm:$0xff]  ;;  %748 = vmatprep.subr.bf16.mxu0 %v354_v9  ;;  %v346_v17 = vld [vmem:[%s1187_s1 + $0x10] sm:$0xff]  ;;  %v349_v19 = vld [vmem:[%s1188_s2 + $0x8] sm:$0xff]  ;;  %368 = vperm.xlu1 %818, %v350_v16   ;;  %s867_s17 = scalar_lea.vmem %s1144_s21, 16  ;;  %p1206_p12 = scmp.ne.s32.totalorder %s1198_s13, 0 }
  0x4e   : > { %358 = vperm.xlu0 %817, %v348_v15   ;;  %749 = vmatpush3.bf16.msra.mxu0 %v354_v9  ;;  %v351_v20 = vld [vmem:[%s1188_s2 + $0x18] sm:$0xff]  ;;  %v353_v21 = vpack.c.bf16 %v347_v18, %v346_v17  ;;  %v464_v22 = vld [vmem:[%s1190_s4] sm:$0xff]  ;;  %v465_v23 = vld [vmem:[%s1190_s4 + $0x8] sm:$0xff]  ;;  %p868_p11 = scmp.ne.s32.totalorder %s1144_s21, %s867_s17  ;;  %s939_s6 = smov [#allocation7]  }
  0x4f   : > { %752 = vmatprep.mubr.msk.bf16.mxu0 %vm376_vm0, %v352_v14  ;;  %750 = vmatprep.subr.bf16.mxu0 %v355_v13  ;;  %v466_v24 = vld [vmem:[%s1190_s4 + $0x10] sm:$0xff]  ;;  %v467_v25 = vld [vmem:[%s1190_s4 + $0x18] sm:$0xff]  ;;  %v575_v26 = vld [vmem:[%s1191_s5] sm:$0xff]  ;;  %s871_s25 = sshll.u32 %s939_s6, 4  ;;  %s872_s25 = int_to_ptr.vmem [resolvable:$false] %s871_s25 }
  0x50   : > { %v576_v27 = vld [vmem:[%s1191_s5 + $0x8] sm:$0xff]  ;;  %v577_v28 = vld [vmem:[%s1191_s5 + $0x10] sm:$0xff]  ;;  %v578_v29 = vld [vmem:[%s1191_s5 + $0x18] sm:$0xff]  ;;  %p869_p0 = pnand %p868_p11, %p1206_p12  ;;  %s873_s30 = scalar_lea.vmem %s872_s25, 32 }
  0x51   : > { %373 = vperm.xlu1 %818, %v351_v20   ;;  %v579_v30 = vld [vmem:[#allocation2] sm:$0x1]  ;;  %v460_v31 = vld [vmem:[#allocation4] sm:$0xff]  ;;  %v461_v32 = vld [vmem:[#allocation4 + $0x8] sm:$0xff]  ;;  %p874_p4 = scmp.lt.s32.totalorder %s1144_s21, %s872_s25  ;;  %p875_p7 = scmp.lt.s32.totalorder %s873_s30, %s867_s17 }
  0x52   : > { %363 = vperm.xlu0 %817, %v349_v19   ;;  %751 = vmatpush3.bf16.msra.mxu0 %v355_v13  ;;  %v468_v33 = vpack.c.bf16 %v461_v32, %v460_v31  ;;  %v462_v8 = vld [vmem:[#allocation4 + $0x10] sm:$0xff]  ;;  %v463_v9 = vld [vmem:[#allocation4 + $0x18] sm:$0xff]  ;;  %p870_p3 = pneg %p869_p0 }
  0x53   : > { %v469_v10 = vpack.c.bf16 %v463_v9, %v462_v8  ;;  %p876_p8 = por %p875_p7, %p874_p4 }
  0x54   : > { %760 = vmatprep.mubr.msk.bf16.mxu1 %vm376_vm0, %v468_v33 }
  0x55   : > { %753 = vmatmul.mubr.msk.bf16.vlgmr.msra.gmra.mrb[0].mxu0 %vm376_vm0, %v353_v21  ;;  %479 = vperm.xlu1 %818, %v465_v23   ;;  %p877_p9 = pnand %p876_p8, %p870_p3 }
  0x56   : > { %474 = vperm.xlu0 %817, %v464_v22  }
  0x59   : > { %489 = vperm.xlu1 %818, %v467_v25  }
  0x5a   : > { %484 = vperm.xlu0 %817, %v466_v24  }
  0x5d   : > { %587 = vperm.xlu1 %818, %v576_v27  }
  0x5e   : > { %582 = vperm.xlu0 %817, %v575_v26  }
  0x61   : > { %597 = vperm.xlu1 %818, %v578_v29  }
  0x62   : > { %592 = vperm.xlu0 %817, %v577_v28  }
  0x66   : > { %615 = vperm.xlu0 %817, %v579_v30  }
  0xcc   : > { %v369_v34 = vpop.permute.xlu1 %368 }
  0xcd   : > { %v359_v35 = vpop.permute.xlu0 %358 }
  0xd0   : > { %v374_v39 = vpop.permute.xlu1 %373 }
  0xd1   : > { %v364_v42 = vpop.permute.xlu0 %363 }
  0xd4   : > { %v480_v12 = vpop.permute.xlu1 %479 }
  0xd5   : > { %v475_v11 = vpop.permute.xlu0 %474 }
  0xd8   : > { %v490_v17 = vpop.permute.xlu1 %489 }
  0xd9   : > { %v485_v13 = vpop.permute.xlu0 %484 }
 0x128   : > { %v754_v36 = vpop.f32.mrb[0].mxu0 }
 0x129   : > { %v426_v37 = vadd.f32 %v754_v36, %v369_v34  ;;  %v417_v38 = vpop.f32.mrb[1].mxu0 }
 0x12a   : > { %v418_v40 = vadd.f32 %v417_v38, %v359_v35  ;;  %v755_v41 = vpop.f32.mrb[2].mxu0  ;;  %v583_v38 = vpop.permute.xlu0 %582 }
 0x12b   : > { %v434_v43 = vmin.f32 %v426_v37, 0.0  ;;  %v429_v44 = vadd.f32 %v755_v41, %v374_v39  ;;  %v420_v45 = vpop.f32.mrb[3].mxu0  ;;  %vm454_vm1 = vcmp.gt.f32.partialorder %v426_v37, 0.0 }
 0x12c   : > { %v432_v46 = vmin.f32 %v418_v40, 0.0  ;;  %v421_v47 = vadd.f32 %v420_v45, %v364_v42  ;;  %vm452_vm3 = vcmp.gt.f32.partialorder %v418_v40, 0.0  ;;  %v588_v42 = vpop.permute.xlu1 %587 }
 0x12d   : > { %v440_v48 = vmul.f32 1.442695, %v434_v43  ;;  %v435_v49 = vmin.f32 %v429_v44, 0.0  ;;  %vm455_vm2 = vcmp.gt.f32.partialorder %v429_v44, 0.0 }
 0x12e   : > { %v436_v50 = vmul.f32 1.442695, %v432_v46  ;;  %v433_v51 = vmin.f32 %v421_v47, 0.0  ;;  %vm453_vm4 = vcmp.gt.f32.partialorder %v421_v47, 0.0 }
 0x12f   : > { %819 = vpow2.f32 %v440_v48  ;;  %v442_v52 = vmul.f32 1.442695, %v435_v49 }
 0x130   : > { %821 = vpow2.f32 %v436_v50  ;;  %v438_v53 = vmul.f32 1.442695, %v433_v51  ;;  %v593_v50 = vpop.permute.xlu0 %592 }
 0x131   : > { %823 = vpow2.f32 %v442_v52 }
 0x132   : > { %825 = vpow2.f32 %v438_v53 }
 0x139   : > { %v820_v54 = vpop.eup %819 }
 0x13a   : > { %v822_v55 = vpop.eup %821  ;;  %v729_v56 = vadd.f32 -1.0, %v820_v54  ;;  %v598_v54 = vpop.permute.xlu1 %597 }
 0x13b   : > { %v824_v57 = vpop.eup %823  ;;  %v727_v58 = vadd.f32 -1.0, %v822_v55 }
 0x13c   : > { %v826_v59 = vpop.eup %825  ;;  %v450_v60 = vmul.f32 0.2, %v729_v56  ;;  %v730_v61 = vadd.f32 -1.0, %v824_v57  ;;  %v618_v57 = vlaneseq }
 0x13d   : > { %v728_v62 = vadd.f32 -1.0, %v826_v59  ;;  %v448_v63 = vmul.f32 0.2, %v727_v58 }
 0x13e   : > { %v451_v0 = vmul.f32 0.2, %v730_v61  ;;  %v458_v2 = vsel %vm454_vm1, %v426_v37, %v450_v60  ;;  %v619_v60 = vshrl.u32 %v618_v57, 7 }
 0x13f   : > { %v449_v1 = vmul.f32 0.2, %v728_v62  ;;  %v456_v4 = vsel %vm452_vm3, %v418_v40, %v448_v63 }
 0x140   : > { %v459_v3 = vsel %vm455_vm2, %v429_v44, %v451_v0  ;;  %v620_v63 = vsub.s32 0, %v619_v60 }
 0x141   : > { %v457_v5 = vsel %vm453_vm4, %v421_v47, %v449_v1  ;;  %v471_v6 = vpack.c.bf16 %v459_v3, %v458_v2  ;;  %v616_v1 = vpop.permute.xlu0 %615 }
 0x142   : > { %v470_v7 = vpack.c.bf16 %v457_v5, %v456_v4  ;;  %v621_v3 = vrot.slane %v616_v1, %v620_v63 }
 0x144   : > { %756 = vmatprep.subr.bf16.mxu1 %v470_v7 }
 0x145   : > { %757 = vmatpush3.bf16.msra.mxu1 %v470_v7 }
 0x146   : > { %758 = vmatprep.subr.bf16.mxu1 %v471_v6 }
 0x149   : > { %759 = vmatpush3.bf16.msra.mxu1 %v471_v6 }
 0x14c   : > { %761 = vmatmul.mubr.msk.bf16.vlgmr.msra.gmra.mrb[0].mxu1 %vm376_vm0, %v469_v10 }
 0x21f   : > { %v762_v14 = vpop.f32.mrb[0].mxu1 }
 0x220   : > { %v541_v15 = vadd.f32 %v762_v14, %v485_v13  ;;  %v532_v16 = vpop.f32.mrb[1].mxu1 }
 0x221   : > { %v533_v18 = vadd.f32 %v532_v16, %v475_v11  ;;  %v763_v19 = vpop.f32.mrb[2].mxu1 }
 0x222   : > { %v549_v20 = vmin.f32 %v541_v15, 0.0  ;;  %v544_v21 = vadd.f32 %v763_v19, %v490_v17  ;;  %v535_v22 = vpop.f32.mrb[3].mxu1  ;;  %vm569_vm6 = vcmp.gt.f32.partialorder %v541_v15, 0.0 }
 0x223   : > { %v547_v23 = vmin.f32 %v533_v18, 0.0  ;;  %v536_v24 = vadd.f32 %v535_v22, %v480_v12  ;;  %vm567_vm5 = vcmp.gt.f32.partialorder %v533_v18, 0.0 }
 0x224   : > { %v555_v25 = vmul.f32 1.442695, %v549_v20  ;;  %v550_v26 = vmin.f32 %v544_v21, 0.0  ;;  %vm570_vm8 = vcmp.gt.f32.partialorder %v544_v21, 0.0 }
 0x225   : > { %v551_v27 = vmul.f32 1.442695, %v547_v23  ;;  %v548_v28 = vmin.f32 %v536_v24, 0.0  ;;  %vm568_vm7 = vcmp.gt.f32.partialorder %v536_v24, 0.0 }
 0x226   : > { %827 = vpow2.f32 %v555_v25  ;;  %v557_v29 = vmul.f32 1.442695, %v550_v26 }
 0x227   : > { %829 = vpow2.f32 %v551_v27  ;;  %v553_v30 = vmul.f32 1.442695, %v548_v28 }
 0x228   : > { %831 = vpow2.f32 %v557_v29 }
 0x229   : > { %833 = vpow2.f32 %v553_v30 }
 0x230   : > { %v828_v31 = vpop.eup %827 }
 0x231   : > { %v830_v32 = vpop.eup %829  ;;  %v735_v33 = vadd.f32 -1.0, %v828_v31 }
 0x232   : > { %v832_v34 = vpop.eup %831  ;;  %v733_v35 = vadd.f32 -1.0, %v830_v32 }
 0x233   : > { %v834_v36 = vpop.eup %833  ;;  %v736_v37 = vadd.f32 -1.0, %v832_v34  ;;  %v565_v39 = vmul.f32 0.2, %v735_v33 }
 0x234   : > { %v563_v40 = vmul.f32 0.2, %v733_v35  ;;  %v734_v41 = vadd.f32 -1.0, %v834_v36 }
 0x235   : > { %v566_v44 = vmul.f32 0.2, %v736_v37  ;;  %v573_v46 = vsel %vm569_vm6, %v541_v15, %v565_v39 }
 0x236   : > { %v571_v43 = vsel %vm567_vm5, %v533_v18, %v563_v40  ;;  %v564_v45 = vmul.f32 0.2, %v734_v41  ;;  %v602_v52 = vmul.f32 %v593_v50, %v573_v46 }
 0x237   : > { %v600_v48 = vmul.f32 %v583_v38, %v571_v43  ;;  %v574_v51 = vsel %vm570_vm8, %v544_v21, %v566_v44 }
 0x238   : > { %v572_v47 = vsel %vm568_vm7, %v536_v24, %v564_v45  ;;  %v603_v55 = vmul.f32 %v598_v54, %v574_v51 }
 0x239   : > { %v601_v49 = vmul.f32 %v588_v42, %v572_v47 }
 0x23b   : > { %v604_v53 = vadd.f32 %v601_v49, %v600_v48 }
 0x23d   : > { %v605_v56 = vadd.f32 %v604_v53, %v602_v52 }
 0x23f   : > { %v606_v58 = vadd.f32 %v605_v56, %v603_v55 }
 0x241   : > { %v607_v59 = vrot.slane %v606_v58, 4 }
 0x243   : > { %v608_v61 = vadd.f32 %v607_v59, %v606_v58 }
 0x245   : > { %v609_v62 = vrot.slane %v608_v61, 2 }
 0x247   : > { %v610_v0 = vadd.f32 %v609_v62, %v608_v61 }
 0x249   : > { %v611_v2 = vrot.slane %v610_v0, 1 }
 0x24b   : > { %v612_v4 = vadd.f32 %v611_v2, %v610_v0 }
 0x24d   : > { %v622_v5 = vadd.f32 %v621_v3, %v612_v4 }
 0x24f   : > { %v623_v6 = vsub.f32 0.0, %v622_v5 }
 0x251   : > { %v624_v7 = vmul.f32 1.442695, %v623_v6 }
 0x253   : > { %835 = vpow2.f32 %v624_v7 }
 0x25d   : > { %v836_v8 = vpop.eup %835 }
 0x25e   : > { %v626_v9 = vadd.f32 1.0, %v836_v8 }
 0x260   : > { %837 = vrcp.f32 %v626_v9 }
 0x26a   : > { %v838_v10 = vpop.eup %837 }
 0x26b   : > { %629 = vst [vmem:[%s338_s20] sm:$0x1] %v838_v10 }
 0x26c   : > { %880 = shalt.err (!%p877_p9)
}
 0x26d   : > { %s881_s12 = scalar_lea.hbm %s1142_s24, 16  ;;  %s885_s10 = scalar_lea.hbm %s1193_s7, 32 }
 0x26e   : > { %p882_p13 = scmp.ne.s32.totalorder %s1142_s24, %s881_s12  ;;  %p886_p6 = scmp.lt.u32.totalorder %s1142_s24, %s1193_s7 }
 0x26f   : > { %p887_p10 = scmp.lt.u32.totalorder %s885_s10, %s881_s12  ;;  %p889_p0 = scmp.lt.u32.totalorder %s881_s12, %s1142_s24 }
 0x270   : > { %p883_p2 = pnand %p882_p13, %p1206_p12 }
 0x271   : > { %p888_p11 = por %p887_p10, %p886_p6 }
 0x272   : > { %p884_p5 = pneg %p883_p2 }
 0x273   : > { %p890_p3 = por %p889_p0, %p888_p11 }
 0x275   : > { %p891_p4 = pnand %p890_p3, %p884_p5 }
 0x277   : > { %894 = shalt.err (!%p891_p4)
}
 0x278   : > { %768 = dma.vmem_to_hbm [thread:$0]  (%p1206_p12), %s1144_s21, 16, %s1142_s24, %s631_s18  }
 0x279 PF: > { %s655_s20 = sand.u32 1, %s921_s26   ;;  %p1207_p7 = scmp.ne.s32.totalorder %s1199_s14, 0 }
 0x27a   : > { %s656_s22 = scalar_lea.sflag [#allocation6], %s655_s20 }
 0x27b   : > { %p775_p8 = pnand %p719_p1, %p1207_p7 }
 0x27d   : > { %916 = dma.done.wait (!%p775_p8), %s656_s22, 16  }
 0x27e   : > { %918 = vsyncadd (!%p775_p8), %s656_s22, 4294967280  ;;  %p20_p9 = scmp.ge.s32.totalorder %s1008_s8, 4   ;;  %s1208_s26 = smov %s925_s27 }
 0x27f   : > { %s1209_s27 = smov %s929_s28  ;;  %s1210_s28 = smov %s1020_s11 }
 0x280   : > { %s1211_s29 = smov %s1008_s8  ;;  %22 = sbr.rel (!%p20_p9) target bundleno = 7 (0x7), region = 131 }
 0x287   :  { %660 = vsyncpa [#allocation5], 1 }
 0x288   :  { %662 = vsyncpa [#allocation5 + $0x1], 1 }
 0x289   :  { %663 = vsyncpa [#allocation6], 1 }
 0x28a   :  { %665 = vsyncpa [#allocation6 + $0x1], 1 }

</bundles_post_ra>
